<compile_context>
chip_gen: v7x
topology: tpu7x:2x2x1
jax: 0.10.0
libtpu: 0.0.40
codegen_flags: <defaults>
</compile_context>

<pallas_src>
import functools

import jax
import jax.numpy as jnp
from jax import lax
from jax.experimental import pallas as pl
from jax.experimental.pallas import tpu as pltpu

_LANE = 128


def _round_up(x, m):
    return ((int(x) + int(m) - 1) // int(m)) * int(m)


# ---------------------------------------------------------------------------
# Pallas kernels (fully fused forward)
# ---------------------------------------------------------------------------
def _neighbor_agg(idx_ref, table_ref, wagg_ref):
    """mean_l(table[idx]) @ Wb, with 1/L folded into wagg.

    Gather+reduce happens in-kernel: a one-hot count matrix (VPU compares against a
    lane iota) contracted with the VMEM-resident table on the MXU.
    """
    bt, l_neigh = idx_ref.shape
    vp = table_ref.shape[0]
    idx = idx_ref[...]                                            # (bt, L) int32
    row_ids = lax.broadcasted_iota(jnp.int32, (bt, vp), 1)
    counts = jnp.zeros((bt, vp), jnp.float32)
    for l in range(l_neigh):                                      # static unroll (L small)
        counts = counts + (idx[:, l:l + 1] == row_ids).astype(jnp.float32)
    neigh_sum = jnp.dot(counts.astype(jnp.bfloat16), table_ref[...],
                        preferred_element_type=jnp.float32)       # (bt, Dp)
    return jnp.dot(neigh_sum.astype(jnp.bfloat16), wagg_ref[...],
                   preferred_element_type=jnp.float32)            # mean(neigh) @ Wb


def _uv_two_layer_kernel(self_ref, targ_ref, idx_ref, table_ref,
                         wa_ref, wb_ref, wagg_ref, b_ref, o_ref):
    # uv == False:
    #   h   = relu(self @ Wa + target @ Wb + b)          (concat folded -> two K=D dots)
    #   out = relu(h @ Wa + mean_l(table[idx]) @ Wb + b)
    bias = b_ref[...]
    h = jnp.dot(self_ref[...], wa_ref[...], preferred_element_type=jnp.float32)
    h = h + jnp.dot(targ_ref[...], wb_ref[...], preferred_element_type=jnp.float32)
    h = jnp.maximum(h + bias, 0.0)

    agg = _neighbor_agg(idx_ref, table_ref, wagg_ref)

    out = jnp.dot(h.astype(jnp.bfloat16), wa_ref[...],
                  preferred_element_type=jnp.float32) + agg + bias
    o_ref[...] = jnp.maximum(out, 0.0).astype(o_ref.dtype)


def _uv_one_layer_kernel(self_ref, idx_ref, table_ref, wa_ref, wagg_ref, b_ref, o_ref):
    # uv == True:  out = relu(self @ Wa + mean_l(table[idx]) @ Wb + b)
    bias = b_ref[...]
    agg = _neighbor_agg(idx_ref, table_ref, wagg_ref)
    out = jnp.dot(self_ref[...], wa_ref[...],
                  preferred_element_type=jnp.float32) + agg + bias
    o_ref[...] = jnp.maximum(out, 0.0).astype(o_ref.dtype)


# ---------------------------------------------------------------------------
# Tile planning (VMEM-derived, 16-row aligned, >=2 grid steps when possible)
# ---------------------------------------------------------------------------
def _choose_b_tile(batch, l_neigh, dpad, n_row_inputs):
    bp = _round_up(max(int(batch), 1), 16)
    # per-row VMEM bytes of double-buffered blocked tensors (bf16 feats + i32 idx + f32 out)
    per_row = 2 * (n_row_inputs * dpad * 2 + l_neigh * 4) + 2 * dpad * 4
    try:
        vmem = int(pltpu.get_tpu_info().vmem_capacity_bytes)
    except Exception:
        vmem = 64 << 20                       # conservative (v7x per-TC)
    budget = vmem // 2                        # headroom for resident weights/table/scratch
    cap = max(16, min(2048, (budget // per_row) // 16 * 16))
    b_tile = min(bp, cap)
    # keep >=2 grid steps when the whole padded batch fits one tile (v7x: 2 TCs)
    if b_tile == bp and bp >= 32 and bp % 32 == 0:
        b_tile = bp // 2
    bp = _round_up(bp, b_tile)
    return b_tile, bp


def _vmem_limit_bytes(b_tile, l_neigh, dpad, n_row_inputs, n_weights, table_rows):
    blocked = 2 * b_tile * (n_row_inputs * dpad * 2 + l_neigh * 4)   # double-buffered inputs
    blocked += 2 * b_tile * dpad * 4                                 # double-buffered f32 out
    resident = 2 * (n_weights * dpad * dpad * 2 + table_rows * dpad * 2 + dpad * 4)
    need = blocked + resident + (8 << 20)                            # compiler scratch headroom
    return int(min(max(need, 32 << 20), 60 << 20))                   # stay under v7x 64 MiB


# ---------------------------------------------------------------------------
# pallas_call wrappers (batch-tiled, weights + embedding table resident)
# ---------------------------------------------------------------------------
def _run_two_layer(self_p, targ_p, idx, table, wa, wb, wagg, bias, b_tile, bp):
    B, dpad = self_p.shape
    l_neigh = idx.shape[1]
    vp = table.shape[0]
    pad = bp - B
    if pad:
        self_p = jnp.pad(self_p, ((0, pad), (0, 0)))
        targ_p = jnp.pad(targ_p, ((0, pad), (0, 0)))
        idx = jnp.pad(idx, ((0, pad), (0, 0)))
    vmem = _vmem_limit_bytes(b_tile, l_neigh, dpad, 2, 3, vp)
    out = pl.pallas_call(
        _uv_two_layer_kernel,
        out_shape=jax.ShapeDtypeStruct((bp, dpad), jnp.float32),
        grid=(bp // b_tile,),
        in_specs=[
            pl.BlockSpec((b_tile, dpad), lambda i: (i, 0)),     # self feats (bf16)
            pl.BlockSpec((b_tile, dpad), lambda i: (i, 0)),     # target feats (bf16)
            pl.BlockSpec((b_tile, l_neigh), lambda i: (i, 0)),  # neighbor ids (int32)
            pl.BlockSpec((vp, dpad), lambda i: (0, 0)),         # resident embedding table
            pl.BlockSpec((dpad, dpad), lambda i: (0, 0)),       # Wa
            pl.BlockSpec((dpad, dpad), lambda i: (0, 0)),       # Wb
            pl.BlockSpec((dpad, dpad), lambda i: (0, 0)),       # Wb / L
            pl.BlockSpec((1, dpad), lambda i: (0, 0)),          # bias (f32)
        ],
        out_specs=pl.BlockSpec((b_tile, dpad), lambda i: (i, 0)),
        compiler_params=pltpu.CompilerParams(
            dimension_semantics=("parallel",), vmem_limit_bytes=vmem),
    )(self_p, targ_p, idx, table, wa, wb, wagg, bias)
    return out[:B] if pad else out


def _run_one_layer(self_p, idx, table, wa, wagg, bias, b_tile, bp):
    B, dpad = self_p.shape
    l_neigh = idx.shape[1]
    vp = table.shape[0]
    pad = bp - B
    if pad:
        self_p = jnp.pad(self_p, ((0, pad), (0, 0)))
        idx = jnp.pad(idx, ((0, pad), (0, 0)))
    vmem = _vmem_limit_bytes(b_tile, l_neigh, dpad, 1, 2, vp)
    out = pl.pallas_call(
        _uv_one_layer_kernel,
        out_shape=jax.ShapeDtypeStruct((bp, dpad), jnp.float32),
        grid=(bp // b_tile,),
        in_specs=[
            pl.BlockSpec((b_tile, dpad), lambda i: (i, 0)),
            pl.BlockSpec((b_tile, l_neigh), lambda i: (i, 0)),
            pl.BlockSpec((vp, dpad), lambda i: (0, 0)),
            pl.BlockSpec((dpad, dpad), lambda i: (0, 0)),
            pl.BlockSpec((dpad, dpad), lambda i: (0, 0)),
            pl.BlockSpec((1, dpad), lambda i: (0, 0)),
        ],
        out_specs=pl.BlockSpec((b_tile, dpad), lambda i: (i, 0)),
        compiler_params=pltpu.CompilerParams(
            dimension_semantics=("parallel",), vmem_limit_bytes=vmem),
    )(self_p, idx, table, wa, wagg, bias)
    return out[:B] if pad else out


# ---------------------------------------------------------------------------
# jitted forward paths (only small (B, Dp) / (B, L) gathers remain in XLA)
# ---------------------------------------------------------------------------
@functools.partial(jax.jit, static_argnames=("b_tile", "bp", "d"))
def _forward_user_side(u2e_pad, v2e_pad, history_u, wa, wb, wagg, bias,
                       nodes, nodes_target, *, b_tile, bp, d):
    # uv == False: self is a user, neighbors are items, linear1 applied twice.
    self_feats = u2e_pad[nodes]            # (B, Dp) bf16 — small XLA gather
    targ_feats = v2e_pad[nodes_target]     # (B, Dp)
    neigh_idx = history_u[nodes]           # (B, L) int32; neighbor rows gathered IN-KERNEL
    out = _run_two_layer(self_feats, targ_feats, neigh_idx, v2e_pad,
                         wa, wb, wagg, bias, b_tile, bp)
    return out[:, :d]


@functools.partial(jax.jit, static_argnames=("b_tile", "bp", "d"))
def _forward_item_side(v2e_pad, u2e_pad, history_v, wa, wagg, bias, nodes, *, b_tile, bp, d):
    # uv == True: self is an item, neighbors are users, linear1 applied once.
    # TODO(synk): the real injected aggregator also receives target_feats; the
    # mean-aggregator stand-in ignores it, so that gather is dropped here.
    self_feats = v2e_pad[nodes]
    neigh_idx = history_v[nodes]
    out = _run_one_layer(self_feats, neigh_idx, u2e_pad, wa, wagg, bias, b_tile, bp)
    return out[:, :d]


# ---------------------------------------------------------------------------
# UV_Encoder (JAX/Pallas version)
# ---------------------------------------------------------------------------
class UVEncoderPallas:
    """JAX/Pallas port of UV_Encoder.forward.

    TODO(synk): the real `aggregator` is an externally injected nn.Module and the
    history/adjacency structures are ragged python dict-of-lists; here a deterministic
    mean-of-neighbor-embeddings aggregator (fused into the kernel) stands in, and the
    histories are fixed-length int32 index tables (rating lists / percent sampling unused).
    """

    def __init__(self, u2e_w, v2e_w, embed_dim, history_u, history_v,
                 lin_w, lin_b, percent=1.0, param_dtype=jnp.bfloat16):
        D = int(embed_dim)
        Dp = _round_up(D, _LANE)            # lane-dense output / weight columns
        self.embed_dim = D
        self.dpad = Dp
        self.p = percent

        nu, nv = int(u2e_w.shape[0]), int(v2e_w.shape[0])
        up, vp = _round_up(nu, _LANE), _round_up(nv, _LANE)
        # bf16, zero-padded (rows -> 128-mult for the one-hot contraction, cols -> Dp).
        # TODO(synk): on v7x/v5e these tables could be stored fp8/int8 to halve the read.
        self.u2e_pad = jnp.zeros((up, Dp), param_dtype).at[:nu, :D].set(
            jnp.asarray(u2e_w, param_dtype))
        self.v2e_pad = jnp.zeros((vp, Dp), param_dtype).at[:nv, :D].set(
            jnp.asarray(v2e_w, param_dtype))

        self.history_u = jnp.asarray(history_u, jnp.int32)     # (num_users, L_u) item ids
        self.history_v = jnp.asarray(history_v, jnp.int32)     # (num_items, L_v) user ids
        self.l_u = int(self.history_u.shape[1])
        self.l_v = int(self.history_v.shape[1])

        # PyTorch Linear weight is (out=D, in=2D); x @ W.T == linear1(x).
        w_t = jnp.asarray(lin_w, jnp.float32).T                # (2D, D)
        wa, wb = w_t[:D], w_t[D:]                              # first/second-half weights

        def _pad_w(w):
            return jnp.zeros((Dp, Dp), param_dtype).at[:D, :D].set(w.astype(param_dtype))

        self.wa = _pad_w(wa)                                   # applies to self / h
        self.wb = _pad_w(wb)                                   # applies to target
        self.wagg_u = _pad_w(wb / self.l_u)                    # 1/L folded in (uv=False)
        self.wagg_v = _pad_w(wb / self.l_v)                    # 1/L folded in (uv=True)
        self.bias = jnp.zeros((1, Dp), jnp.float32).at[0, :D].set(
            jnp.asarray(lin_b, jnp.float32))

    def forward(self, nodes, nodes_target, uv):
        nodes = jnp.asarray(nodes, jnp.int32)
        nodes_target = jnp.asarray(nodes_target, jnp.int32)
        B = int(nodes.shape[0])
        if uv:
            b_tile, bp = _choose_b_tile(B, self.l_v, self.dpad, n_row_inputs=1)
            return _forward_item_side(self.v2e_pad, self.u2e_pad, self.history_v,
                                      self.wa, self.wagg_v, self.bias, nodes,
                                      b_tile=b_tile, bp=bp, d=self.embed_dim)
        b_tile, bp = _choose_b_tile(B, self.l_u, self.dpad, n_row_inputs=2)
        return _forward_user_side(self.u2e_pad, self.v2e_pad, self.history_u,
                                  self.wa, self.wb, self.wagg_u, self.bias,
                                  nodes, nodes_target,
                                  b_tile=b_tile, bp=bp, d=self.embed_dim)


# ---------------------------------------------------------------------------
# Main
# ---------------------------------------------------------------------------
if __name__ == "__main__":
    key = jax.random.PRNGKey(0)
    k_u, k_v, k_w, k_b, k_hu, k_hv, k_n, k_t = jax.random.split(key, 8)

    num_users, num_items = 16, 20
    embed_dim = 32
    batch = 8
    n_neigh = 8

    # deterministic "embedding tables" and linear1 parameters
    u2e_w = jax.random.normal(k_u, (num_users, embed_dim), dtype=jnp.float32) * 0.1
    v2e_w = jax.random.normal(k_v, (num_items, embed_dim), dtype=jnp.float32) * 0.1
    lin_w = jax.random.normal(k_w, (embed_dim, 2 * embed_dim), dtype=jnp.float32) * 0.1
    lin_b = jax.random.normal(k_b, (embed_dim,), dtype=jnp.float32) * 0.1

    # deterministic fixed-length history / adjacency tables
    history_u = jax.random.randint(k_hu, (num_users, n_neigh), 0, num_items)  # user -> items
    history_v = jax.random.randint(k_hv, (num_items, n_neigh), 0, num_users)  # item -> users

    nodes = jax.random.randint(k_n, (batch,), 0, num_users)
    nodes_target = jax.random.randint(k_t, (batch,), 0, num_items)

    enc = UVEncoderPallas(u2e_w, v2e_w, embed_dim, history_u, history_v,
                          lin_w, lin_b, percent=1.0)

    # uv == False path (user side: linear1 applied twice)
    out_u = enc.forward(nodes, nodes_target, uv=False)
    # uv == True path (item side: linear1 applied once)
    nodes_i = jax.random.randint(k_t, (batch,), 0, num_items)
    nodes_target_u = jax.random.randint(k_n, (batch,), 0, num_users)
    out_v = enc.forward(nodes_i, nodes_target_u, uv=True)

    jax.block_until_ready(out_u)
    jax.block_until_ready(out_v)

    # pure-JAX reference (same bf16 parameter values, f32 math)
    u32 = enc.u2e_pad[:num_users, :embed_dim].astype(jnp.float32)
    v32 = enc.v2e_pad[:num_items, :embed_dim].astype(jnp.float32)
    wa32 = enc.wa[:embed_dim, :embed_dim].astype(jnp.float32)
    wb32 = enc.wb[:embed_dim, :embed_dim].astype(jnp.float32)
    b32 = enc.bias[0, :embed_dim]

    sf = u32[nodes]
    tf = v32[nodes_target]
    h_ref = jnp.maximum(sf @ wa32 + tf @ wb32 + b32, 0.0)
    nm = jnp.mean(v32[enc.history_u[nodes]], axis=1)
    ref_u = jnp.maximum(h_ref @ wa32 + nm @ wb32 + b32, 0.0)

    sf_i = v32[nodes_i]
    nm_i = jnp.mean(u32[enc.history_v[nodes_i]], axis=1)
    ref_v = jnp.maximum(sf_i @ wa32 + nm_i @ wb32 + b32, 0.0)

    assert out_u.shape == (batch, embed_dim) and out_v.shape == (batch, embed_dim)
    assert jnp.allclose(out_u, ref_u, atol=1e-2, rtol=1e-2), "uv=False mismatch vs reference"
    assert jnp.allclose(out_v, ref_v, atol=1e-2, rtol=1e-2), "uv=True mismatch vs reference"
    print("KERNEL_OK")
</pallas_src>

<mosaic_0001>
module attributes {stable_mosaic.version = 11 : i64} {
  func.func @_uv_two_layer_kernel(%arg0: i32, %arg1: memref<16x128xbf16, #tpu.memory_space<vmem>>, %arg2: memref<16x128xbf16, #tpu.memory_space<vmem>>, %arg3: memref<16x8xi32, #tpu.memory_space<vmem>>, %arg4: memref<128x128xbf16, #tpu.memory_space<vmem>>, %arg5: memref<128x128xbf16, #tpu.memory_space<vmem>>, %arg6: memref<128x128xbf16, #tpu.memory_space<vmem>>, %arg7: memref<128x128xbf16, #tpu.memory_space<vmem>>, %arg8: memref<1x128xf32, #tpu.memory_space<vmem>>, %arg9: memref<16x128xf32, #tpu.memory_space<vmem>>) attributes {dimension_semantics = [#tpu.dimension_semantics<parallel>], iteration_bounds = array<i64: 1>, scalar_prefetch = 0 : i64, scratch_operands = 0 : i64, tpu.core_type = #tpu.core_type<tc>, window_params = [{transform_indices = @transform_0, window_bounds = array<i64: 16, 128>}, {transform_indices = @transform_1, window_bounds = array<i64: 16, 128>}, {transform_indices = @transform_2, window_bounds = array<i64: 16, 8>}, {pipeline_mode = #tpu.pipeline_mode<synchronous>, transform_indices = @transform_3, window_bounds = array<i64: 128, 128>}, {pipeline_mode = #tpu.pipeline_mode<synchronous>, transform_indices = @transform_4, window_bounds = array<i64: 128, 128>}, {pipeline_mode = #tpu.pipeline_mode<synchronous>, transform_indices = @transform_5, window_bounds = array<i64: 128, 128>}, {pipeline_mode = #tpu.pipeline_mode<synchronous>, transform_indices = @transform_6, window_bounds = array<i64: 128, 128>}, {pipeline_mode = #tpu.pipeline_mode<synchronous>, transform_indices = @transform_7, window_bounds = array<i64: 1, 128>}, {transform_indices = @transform_8, window_bounds = array<i64: 16, 128>}]} {
    %c0 = arith.constant 0 : index
    %c0_0 = arith.constant 0 : index
    %0 = vector.load %arg8[%c0, %c0_0] : memref<1x128xf32, #tpu.memory_space<vmem>>, vector<1x128xf32>
    %c0_1 = arith.constant 0 : index
    %c0_2 = arith.constant 0 : index
    %1 = vector.load %arg1[%c0_1, %c0_2] : memref<16x128xbf16, #tpu.memory_space<vmem>>, vector<16x128xbf16>
    %c0_3 = arith.constant 0 : index
    %c0_4 = arith.constant 0 : index
    %2 = vector.load %arg5[%c0_3, %c0_4] : memref<128x128xbf16, #tpu.memory_space<vmem>>, vector<128x128xbf16>
    %cst = arith.constant dense<0.000000e+00> : vector<16x128xf32>
    %3 = tpu.matmul %1, %2, %cst {dimension_numbers = #tpu.dot_dimension_numbers<[1], [0], [0], [1], [0, 0, 1, 1], [], []>} : vector<16x128xbf16>, vector<128x128xbf16>, vector<16x128xf32> -> vector<16x128xf32>
    %c0_5 = arith.constant 0 : index
    %c0_6 = arith.constant 0 : index
    %4 = vector.load %arg2[%c0_5, %c0_6] : memref<16x128xbf16, #tpu.memory_space<vmem>>, vector<16x128xbf16>
    %c0_7 = arith.constant 0 : index
    %c0_8 = arith.constant 0 : index
    %5 = vector.load %arg6[%c0_7, %c0_8] : memref<128x128xbf16, #tpu.memory_space<vmem>>, vector<128x128xbf16>
    %cst_9 = arith.constant dense<0.000000e+00> : vector<16x128xf32>
    %6 = tpu.matmul %4, %5, %cst_9 {dimension_numbers = #tpu.dot_dimension_numbers<[1], [0], [0], [1], [0, 0, 1, 1], [], []>} : vector<16x128xbf16>, vector<128x128xbf16>, vector<16x128xf32> -> vector<16x128xf32>
    %7 = arith.addf %3, %6 : vector<16x128xf32>
    %8 = vector.broadcast %0 : vector<1x128xf32> to vector<16x128xf32>
    %9 = arith.addf %7, %8 : vector<16x128xf32>
    %cst_10 = arith.constant 0.000000e+00 : f32
    %10 = vector.broadcast %cst_10 : f32 to vector<16x128xf32>
    %11 = arith.maximumf %9, %10 : vector<16x128xf32>
    %c0_11 = arith.constant 0 : index
    %c0_12 = arith.constant 0 : index
    %12 = vector.load %arg3[%c0_11, %c0_12] : memref<16x8xi32, #tpu.memory_space<vmem>>, vector<16x8xi32>
    %13 = tpu.iota {dimensions = array<i32: 1>} : vector<16x128xi32>
    %cst_13 = arith.constant 0.000000e+00 : f32
    %14 = vector.broadcast %cst_13 : f32 to vector<16x128xf32>
    %15 = vector.extract_strided_slice %12 {offsets = [0, 0], sizes = [16, 1], strides = [1, 1]} : vector<16x8xi32> to vector<16x1xi32>
    %16 = vector.broadcast %15 : vector<16x1xi32> to vector<16x128xi32>
    %17 = arith.cmpi eq, %16, %13 : vector<16x128xi32>
    %18 = arith.extui %17 : vector<16x128xi1> to vector<16x128xi32>
    %19 = arith.sitofp %18 : vector<16x128xi32> to vector<16x128xf32>
    %20 = arith.addf %14, %19 : vector<16x128xf32>
    %21 = vector.extract_strided_slice %12 {offsets = [0, 1], sizes = [16, 1], strides = [1, 1]} : vector<16x8xi32> to vector<16x1xi32>
    %22 = vector.broadcast %21 : vector<16x1xi32> to vector<16x128xi32>
    %23 = arith.cmpi eq, %22, %13 : vector<16x128xi32>
    %24 = arith.extui %23 : vector<16x128xi1> to vector<16x128xi32>
    %25 = arith.sitofp %24 : vector<16x128xi32> to vector<16x128xf32>
    %26 = arith.addf %20, %25 : vector<16x128xf32>
    %27 = vector.extract_strided_slice %12 {offsets = [0, 2], sizes = [16, 1], strides = [1, 1]} : vector<16x8xi32> to vector<16x1xi32>
    %28 = vector.broadcast %27 : vector<16x1xi32> to vector<16x128xi32>
    %29 = arith.cmpi eq, %28, %13 : vector<16x128xi32>
    %30 = arith.extui %29 : vector<16x128xi1> to vector<16x128xi32>
    %31 = arith.sitofp %30 : vector<16x128xi32> to vector<16x128xf32>
    %32 = arith.addf %26, %31 : vector<16x128xf32>
    %33 = vector.extract_strided_slice %12 {offsets = [0, 3], sizes = [16, 1], strides = [1, 1]} : vector<16x8xi32> to vector<16x1xi32>
    %34 = vector.broadcast %33 : vector<16x1xi32> to vector<16x128xi32>
    %35 = arith.cmpi eq, %34, %13 : vector<16x128xi32>
    %36 = arith.extui %35 : vector<16x128xi1> to vector<16x128xi32>
    %37 = arith.sitofp %36 : vector<16x128xi32> to vector<16x128xf32>
    %38 = arith.addf %32, %37 : vector<16x128xf32>
    %39 = vector.extract_strided_slice %12 {offsets = [0, 4], sizes = [16, 1], strides = [1, 1]} : vector<16x8xi32> to vector<16x1xi32>
    %40 = vector.broadcast %39 : vector<16x1xi32> to vector<16x128xi32>
    %41 = arith.cmpi eq, %40, %13 : vector<16x128xi32>
    %42 = arith.extui %41 : vector<16x128xi1> to vector<16x128xi32>
    %43 = arith.sitofp %42 : vector<16x128xi32> to vector<16x128xf32>
    %44 = arith.addf %38, %43 : vector<16x128xf32>
    %45 = vector.extract_strided_slice %12 {offsets = [0, 5], sizes = [16, 1], strides = [1, 1]} : vector<16x8xi32> to vector<16x1xi32>
    %46 = vector.broadcast %45 : vector<16x1xi32> to vector<16x128xi32>
    %47 = arith.cmpi eq, %46, %13 : vector<16x128xi32>
    %48 = arith.extui %47 : vector<16x128xi1> to vector<16x128xi32>
    %49 = arith.sitofp %48 : vector<16x128xi32> to vector<16x128xf32>
    %50 = arith.addf %44, %49 : vector<16x128xf32>
    %51 = vector.extract_strided_slice %12 {offsets = [0, 6], sizes = [16, 1], strides = [1, 1]} : vector<16x8xi32> to vector<16x1xi32>
    %52 = vector.broadcast %51 : vector<16x1xi32> to vector<16x128xi32>
    %53 = arith.cmpi eq, %52, %13 : vector<16x128xi32>
    %54 = arith.extui %53 : vector<16x128xi1> to vector<16x128xi32>
    %55 = arith.sitofp %54 : vector<16x128xi32> to vector<16x128xf32>
    %56 = arith.addf %50, %55 : vector<16x128xf32>
    %57 = vector.extract_strided_slice %12 {offsets = [0, 7], sizes = [16, 1], strides = [1, 1]} : vector<16x8xi32> to vector<16x1xi32>
    %58 = vector.broadcast %57 : vector<16x1xi32> to vector<16x128xi32>
    %59 = arith.cmpi eq, %58, %13 : vector<16x128xi32>
    %60 = arith.extui %59 : vector<16x128xi1> to vector<16x128xi32>
    %61 = arith.sitofp %60 : vector<16x128xi32> to vector<16x128xf32>
    %62 = arith.addf %56, %61 : vector<16x128xf32>
    %63 = arith.truncf %62 : vector<16x128xf32> to vector<16x128xbf16>
    %c0_14 = arith.constant 0 : index
    %c0_15 = arith.constant 0 : index
    %64 = vector.load %arg4[%c0_14, %c0_15] : memref<128x128xbf16, #tpu.memory_space<vmem>>, vector<128x128xbf16>
    %cst_16 = arith.constant dense<0.000000e+00> : vector<16x128xf32>
    %65 = tpu.matmul %63, %64, %cst_16 {dimension_numbers = #tpu.dot_dimension_numbers<[1], [0], [0], [1], [0, 0, 1, 1], [], []>} : vector<16x128xbf16>, vector<128x128xbf16>, vector<16x128xf32> -> vector<16x128xf32>
    %66 = arith.truncf %65 : vector<16x128xf32> to vector<16x128xbf16>
    %c0_17 = arith.constant 0 : index
    %c0_18 = arith.constant 0 : index
    %67 = vector.load %arg7[%c0_17, %c0_18] : memref<128x128xbf16, #tpu.memory_space<vmem>>, vector<128x128xbf16>
    %cst_19 = arith.constant dense<0.000000e+00> : vector<16x128xf32>
    %68 = tpu.matmul %66, %67, %cst_19 {dimension_numbers = #tpu.dot_dimension_numbers<[1], [0], [0], [1], [0, 0, 1, 1], [], []>} : vector<16x128xbf16>, vector<128x128xbf16>, vector<16x128xf32> -> vector<16x128xf32>
    %69 = arith.truncf %11 : vector<16x128xf32> to vector<16x128xbf16>
    %c0_20 = arith.constant 0 : index
    %c0_21 = arith.constant 0 : index
    %70 = vector.load %arg5[%c0_20, %c0_21] : memref<128x128xbf16, #tpu.memory_space<vmem>>, vector<128x128xbf16>
    %cst_22 = arith.constant dense<0.000000e+00> : vector<16x128xf32>
    %71 = tpu.matmul %69, %70, %cst_22 {dimension_numbers = #tpu.dot_dimension_numbers<[1], [0], [0], [1], [0, 0, 1, 1], [], []>} : vector<16x128xbf16>, vector<128x128xbf16>, vector<16x128xf32> -> vector<16x128xf32>
    %72 = arith.addf %71, %68 : vector<16x128xf32>
    %73 = vector.broadcast %0 : vector<1x128xf32> to vector<16x128xf32>
    %74 = arith.addf %72, %73 : vector<16x128xf32>
    %cst_23 = arith.constant 0.000000e+00 : f32
    %75 = vector.broadcast %cst_23 : f32 to vector<16x128xf32>
    %76 = arith.maximumf %74, %75 : vector<16x128xf32>
    %c0_24 = arith.constant 0 : index
    %c0_25 = arith.constant 0 : index
    %77 = vector.load %arg9[%c0_24, %c0_25] : memref<16x128xf32, #tpu.memory_space<vmem>>, vector<16x128xf32>
    tpu.vector_store %arg9[%c0_24, %c0_25], %76 {strides = array<i32>} : memref<16x128xf32, #tpu.memory_space<vmem>>, vector<16x128xf32>,
    return
  }
  func.func @transform_0(%arg0: i32) -> (i32, i32) {
    %c0_i32 = arith.constant 0 : i32
    %c0_i32_0 = arith.constant 0 : i32
    return %arg0, %c0_i32 : i32, i32
  }
  func.func @transform_1(%arg0: i32) -> (i32, i32) {
    %c0_i32 = arith.constant 0 : i32
    %c0_i32_0 = arith.constant 0 : i32
    return %arg0, %c0_i32 : i32, i32
  }
  func.func @transform_2(%arg0: i32) -> (i32, i32) {
    %c0_i32 = arith.constant 0 : i32
    %c0_i32_0 = arith.constant 0 : i32
    return %arg0, %c0_i32 : i32, i32
  }
  func.func @transform_3(%arg0: i32) -> (i32, i32) {
    %c0_i32 = arith.constant 0 : i32
    %c0_i32_0 = arith.constant 0 : i32
    %c0_i32_1 = arith.constant 0 : i32
    return %c0_i32, %c0_i32_0 : i32, i32
  }
  func.func @transform_4(%arg0: i32) -> (i32, i32) {
    %c0_i32 = arith.constant 0 : i32
    %c0_i32_0 = arith.constant 0 : i32
    %c0_i32_1 = arith.constant 0 : i32
    return %c0_i32, %c0_i32_0 : i32, i32
  }
  func.func @transform_5(%arg0: i32) -> (i32, i32) {
    %c0_i32 = arith.constant 0 : i32
    %c0_i32_0 = arith.constant 0 : i32
    %c0_i32_1 = arith.constant 0 : i32
    return %c0_i32, %c0_i32_0 : i32, i32
  }
  func.func @transform_6(%arg0: i32) -> (i32, i32) {
    %c0_i32 = arith.constant 0 : i32
    %c0_i32_0 = arith.constant 0 : i32
    %c0_i32_1 = arith.constant 0 : i32
    return %c0_i32, %c0_i32_0 : i32, i32
  }
  func.func @transform_7(%arg0: i32) -> (i32, i32) {
    %c0_i32 = arith.constant 0 : i32
    %c0_i32_0 = arith.constant 0 : i32
    %c0_i32_1 = arith.constant 0 : i32
    return %c0_i32, %c0_i32_0 : i32, i32
  }
  func.func @transform_8(%arg0: i32) -> (i32, i32) {
    %c0_i32 = arith.constant 0 : i32
    %c0_i32_0 = arith.constant 0 : i32
    return %arg0, %c0_i32 : i32, i32
  }
}

</mosaic_0001>

<bundles_post_ra>
// kernel: _forward_user_side.1
= control target key start
LH: loop header
LB: loop body
LE: loop exit
PB: predicated region body
PF: predicated region fallthrough
CT: control target
= control target key end

     0   :  { %v900_v0 = vmov 1   ;;  %v901_v1 = vmov 0   ;;  %v902_v5 = vmov 0.0   ;;  %v903_v11 = vmov 2   ;;  %s1190_s2 = inlined_call_operand.vmem [shape: s32[16,8], index: 2, kind: input, shape index: {}]   ;;  %s1191_s5 = inlined_call_operand.vmem [shape: bf16[128,128], index: 5, kind: input, shape index: {}]   ;;  %s1192_s4 = inlined_call_operand.vmem [shape: bf16[128,128], index: 4, kind: input, shape index: {}]   ;;  %s1193_s1 = inlined_call_operand.vmem [shape: bf16[16,128], index: 1, kind: input, shape index: {}]   ;;  %s1194_s0 = inlined_call_operand.vmem [shape: bf16[16,128], index: 0, kind: input, shape index: {}]   ;;  %s1195_s3 = inlined_call_operand.vmem [shape: bf16[128,128], index: 3, kind: input, shape index: {}]   ;;  %s1196_s6 = inlined_call_operand.vmem [shape: bf16[128,128], index: 6, kind: input, shape index: {}]   ;;  %s1197_s7 = inlined_call_operand.vmem [shape: f32[1,128], index: 7, kind: input, shape index: {}]   ;;  %s1198_s8 = inlined_call_operand.vmem [shape: f32[16,128], index: 8, kind: output, shape index: {}]  }
   0x1   :  { %854 = vset.pattern.permute.xlu1 %v900_v0  ;;  %853 = vset.pattern.permute.xlu0 %v901_v1  ;;  %v958_v2 = vld [vmem:[%s1190_s2] sm:$0xff]  ;;  %v963_v3 = vld [vmem:[%s1190_s2 + $0x8] sm:$0xff]  ;;  %v870_v9 = vld [vmem:[%s1191_s5 + $0x10] sm:$0xff]   ;;  %vm904_vm0 = vmmov 0   ;;  %v905_v14 = vmov 3   ;;  %v906_v17 = vmov 4   ;;  %v269_v47 = vlaneseq }
   0x2   :  { %286 = vperm.xlu1 %854, %v958_v2   ;;  %272 = vperm.xlu0 %853, %v958_v2   ;;  %v866_v4 = vld [vmem:[%s1191_s5] sm:$0xff]   ;;  %v868_v7 = vld [vmem:[%s1191_s5 + $0x8] sm:$0xff]   ;;  %v998_v10 = vld [vmem:[%s1192_s4 + $0x10] sm:$0xff]   ;;  %v907_v18 = vmov 5   ;;  %v908_v21 = vmov 6   ;;  %v909_v26 = vmov 7  }
   0x3   :  { %743 = vmatprep.subr.bf16.mxu0 %v902_v5  ;;  %763 = vmatprep.subr.bf16.mxu1 %v902_v5  ;;  %v975_v6 = vld [vmem:[%s1192_s4] sm:$0xff]   ;;  %v985_v8 = vld [vmem:[%s1192_s4 + $0x8] sm:$0xff]   ;;  %v872_v12 = vld [vmem:[%s1191_s5 + $0x18] sm:$0xff]   ;;  %v270_v51 = vand.u32 127, %v269_v47 }
   0x4   :  { %744 = vmatpush3.bf16.msra.mxu0 %v866_v4  ;;  %764 = vmatpush3.bf16.msra.mxu1 %v975_v6  ;;  %v1011_v13 = vld [vmem:[%s1192_s4 + $0x18] sm:$0xff]   ;;  %v874_v15 = vld [vmem:[%s1191_s5 + $0x20] sm:$0xff]   ;;  %v876_v19 = vld [vmem:[%s1191_s5 + $0x28] sm:$0xff]  }
   0x5   :  { %745 = vmatprep.subr.bf16.mxu0 %v902_v5  ;;  %765 = vmatprep.subr.bf16.mxu1 %v902_v5  ;;  %v1027_v16 = vld [vmem:[%s1192_s4 + $0x20] sm:$0xff]   ;;  %v1039_v20 = vld [vmem:[%s1192_s4 + $0x28] sm:$0xff]   ;;  %v878_v22 = vld [vmem:[%s1191_s5 + $0x30] sm:$0xff]  }
   0x6   :  { %289 = vperm.xlu1 %854, %v963_v3   ;;  %275 = vperm.xlu0 %853, %v963_v3   ;;  %v1054_v23 = vld [vmem:[%s1192_s4 + $0x30] sm:$0xff]   ;;  %v880_v24 = vld [vmem:[%s1191_s5 + $0x38] sm:$0xff]   ;;  %v882_v27 = vld [vmem:[%s1193_s1] sm:$0xff]  }
   0x7   :  { %759 = vmatprep.mubr.msk.bf16.mxu0 %vm904_vm0, %v902_v5  ;;  %779 = vmatprep.mubr.msk.bf16.mxu1 %vm904_vm0, %v902_v5  ;;  %v1066_v25 = vld [vmem:[%s1192_s4 + $0x38] sm:$0xff]   ;;  %v883_v28 = vld [vmem:[%s1194_s0] sm:$0xff]   ;;  %v885_v30 = vld [vmem:[%s1195_s3 + $0x8] sm:$0xff]  }
   0x8   :  { %746 = vmatpush3.bf16.msra.mxu0 %v868_v7  ;;  %766 = vmatpush3.bf16.msra.mxu1 %v985_v8  ;;  %v884_v29 = vld [vmem:[%s1195_s3] sm:$0xff]   ;;  %v886_v31 = vld [vmem:[%s1195_s3 + $0x10] sm:$0xff]   ;;  %v887_v32 = vld [vmem:[%s1195_s3 + $0x18] sm:$0xff]  }
   0x9   :  { %747 = vmatprep.subr.bf16.mxu0 %v902_v5  ;;  %767 = vmatprep.subr.bf16.mxu1 %v902_v5  ;;  %v888_v33 = vld [vmem:[%s1195_s3 + $0x20] sm:$0xff]   ;;  %v889_v34 = vld [vmem:[%s1195_s3 + $0x28] sm:$0xff]   ;;  %v890_v35 = vld [vmem:[%s1195_s3 + $0x30] sm:$0xff]  }
   0xa   :  { %856 = vset.pattern.permute.xlu1 %v903_v11  ;;  %855 = vset.pattern.permute.xlu0 %v903_v11  ;;  %v891_v36 = vld [vmem:[%s1195_s3 + $0x38] sm:$0xff]   ;;  %v892_v38 = vld [vmem:[%s1196_s6] sm:$0xff]   ;;  %v893_v40 = vld [vmem:[%s1196_s6 + $0x8] sm:$0xff]  }
   0xb   :  { %303 = vperm.xlu1 %856, %v963_v3   ;;  %300 = vperm.xlu0 %855, %v958_v2   ;;  %v894_v43 = vld [vmem:[%s1196_s6 + $0x10] sm:$0xff]   ;;  %v895_v44 = vld [vmem:[%s1196_s6 + $0x18] sm:$0xff]   ;;  %v896_v48 = vld [vmem:[%s1196_s6 + $0x20] sm:$0xff]  }
   0xc   :  { %748 = vmatpush3.bf16.msra.mxu0 %v870_v9  ;;  %768 = vmatpush3.bf16.msra.mxu1 %v998_v10  ;;  %v897_v52 = vld [vmem:[%s1196_s6 + $0x28] sm:$0xff]   ;;  %v898_v54 = vld [vmem:[%s1196_s6 + $0x30] sm:$0xff]  }
   0xd   :  { %749 = vmatprep.subr.bf16.mxu0 %v902_v5  ;;  %769 = vmatprep.subr.bf16.mxu1 %v902_v5 }
   0xf   :  { %857 = vset.pattern.permute.xlu1 %v905_v14  ;;  %858 = vset.pattern.permute.xlu0 %v905_v14 }
  0x10   :  { %314 = vperm.xlu1 %857, %v958_v2   ;;  %317 = vperm.xlu0 %858, %v963_v3  }
  0x11   :  { %750 = vmatpush3.bf16.msra.mxu0 %v872_v12  ;;  %770 = vmatpush3.bf16.msra.mxu1 %v1011_v13 }
  0x12   :  { %751 = vmatprep.subr.bf16.mxu0 %v902_v5  ;;  %771 = vmatprep.subr.bf16.mxu1 %v902_v5 }
  0x14   :  { %859 = vset.pattern.permute.xlu1 %v906_v17  ;;  %860 = vset.pattern.permute.xlu0 %v907_v18 }
  0x15   :  { %328 = vperm.xlu1 %859, %v958_v2   ;;  %342 = vperm.xlu0 %860, %v958_v2  }
  0x16   :  { %752 = vmatpush3.bf16.msra.mxu0 %v874_v15  ;;  %772 = vmatpush3.bf16.msra.mxu1 %v1027_v16 }
  0x17   :  { %753 = vmatprep.subr.bf16.mxu0 %v902_v5  ;;  %773 = vmatprep.subr.bf16.mxu1 %v902_v5 }
  0x19   :  { %331 = vperm.xlu1 %859, %v963_v3   ;;  %863 = vset.pattern.permute.xlu0 %v908_v21 }
  0x1a   :  { %359 = vperm.xlu0 %863, %v963_v3   ;;  %754 = vmatpush3.bf16.msra.mxu0 %v876_v19 }
  0x1b   :  { %774 = vmatpush3.bf16.msra.mxu1 %v1039_v20  ;;  %755 = vmatprep.subr.bf16.mxu0 %v902_v5 }
  0x1c   :  { %775 = vmatprep.subr.bf16.mxu1 %v902_v5 }
  0x1d   :  { %861 = vset.pattern.permute.xlu1 %v907_v18 }
  0x1e   :  { %345 = vperm.xlu1 %861, %v963_v3   ;;  %756 = vmatpush3.bf16.msra.mxu0 %v878_v22 }
  0x1f   :  { %776 = vmatpush3.bf16.msra.mxu1 %v1054_v23  ;;  %757 = vmatprep.subr.bf16.mxu0 %v902_v5 }
  0x20   :  { %777 = vmatprep.subr.bf16.mxu1 %v902_v5  ;;  %865 = vset.pattern.permute.xlu0 %v909_v26 }
  0x22   :  { %862 = vset.pattern.permute.xlu1 %v908_v21  ;;  %758 = vmatpush3.bf16.msra.mxu0 %v880_v24 }
  0x23   :  { %356 = vperm.xlu1 %862, %v958_v2   ;;  %778 = vmatpush3.bf16.msra.mxu1 %v1066_v25 }
  0x24   :  { %783 = vmatprep.subr.bf16.mxu0 %v902_v5  ;;  %803 = vmatprep.subr.bf16.mxu1 %v902_v5 }
  0x25   :  { %760 = vmatmul.mubr.bf16.vlgmr.msra.gmra.mrb[0].mxu0 %v882_v27 }
  0x26   :  { %780 = vmatmul.mubr.bf16.vlgmr.msra.gmra.mrb[0].mxu1 %v883_v28  ;;  %784 = vmatpush3.bf16.msra.mxu0 %v884_v29 }
  0x27   :  { %864 = vset.pattern.permute.xlu1 %v909_v26  ;;  %785 = vmatprep.subr.bf16.mxu0 %v902_v5 }
  0x28   :  { %370 = vperm.xlu1 %864, %v958_v2   ;;  %799 = vmatprep.mubr.msk.bf16.mxu0 %vm904_vm0, %v902_v5 }
  0x29   :  { %819 = vmatprep.mubr.msk.bf16.mxu1 %vm904_vm0, %v902_v5  ;;  %804 = vmatpush3.bf16.msra.mxu1 %v892_v38 }
  0x2a   :  { %786 = vmatpush3.bf16.msra.mxu0 %v885_v30  ;;  %805 = vmatprep.subr.bf16.mxu1 %v902_v5 }
  0x2b   :  { %787 = vmatprep.subr.bf16.mxu0 %v902_v5 }
  0x2c   :  { %373 = vperm.xlu1 %864, %v963_v3  }
  0x2d   :  { %806 = vmatpush3.bf16.msra.mxu1 %v893_v40 }
  0x2e   :  { %788 = vmatpush3.bf16.msra.mxu0 %v886_v31  ;;  %807 = vmatprep.subr.bf16.mxu1 %v902_v5 }
  0x2f   :  { %789 = vmatprep.subr.bf16.mxu0 %v902_v5 }
  0x31   :  { %808 = vmatpush3.bf16.msra.mxu1 %v894_v43 }
  0x32   :  { %790 = vmatpush3.bf16.msra.mxu0 %v887_v32  ;;  %809 = vmatprep.subr.bf16.mxu1 %v902_v5 }
  0x33   :  { %791 = vmatprep.subr.bf16.mxu0 %v902_v5 }
  0x35   :  { %810 = vmatpush3.bf16.msra.mxu1 %v895_v44 }
  0x36   :  { %792 = vmatpush3.bf16.msra.mxu0 %v888_v33  ;;  %811 = vmatprep.subr.bf16.mxu1 %v902_v5 }
  0x37   :  { %793 = vmatprep.subr.bf16.mxu0 %v902_v5 }
  0x39   :  { %812 = vmatpush3.bf16.msra.mxu1 %v896_v48 }
  0x3a   :  { %794 = vmatpush3.bf16.msra.mxu0 %v889_v34  ;;  %813 = vmatprep.subr.bf16.mxu1 %v902_v5 }
  0x3b   :  { %795 = vmatprep.subr.bf16.mxu0 %v902_v5 }
  0x3d   :  { %814 = vmatpush3.bf16.msra.mxu1 %v897_v52 }
  0x3e   :  { %796 = vmatpush3.bf16.msra.mxu0 %v890_v35  ;;  %815 = vmatprep.subr.bf16.mxu1 %v902_v5 }
  0x3f   :  { %797 = vmatprep.subr.bf16.mxu0 %v902_v5 }
  0x41   :  { %816 = vmatpush3.bf16.msra.mxu1 %v898_v54 }
  0x42   :  { %798 = vmatpush3.bf16.msra.mxu0 %v891_v36  ;;  %817 = vmatprep.subr.bf16.mxu1 %v902_v5 }
  0x43   :  { %823 = vmatprep.subr.bf16.mxu0 %v902_v5 }
  0x81   :  { %v287_v37 = vpop.permute.xlu1 %286  ;;  %v273_v41 = vpop.permute.xlu0 %272 }
  0x82   :  { %vm291_vm1 = vcmp.eq.s32.totalorder %v287_v37, %v270_v51  ;;  %vm277_vm2 = vcmp.eq.s32.totalorder %v273_v41, %v270_v51 }
  0x83   :  { %v668_v56 = vsel %vm291_vm1, 1.0, %v902_v5  ;;  %v666_v57 = vsel %vm277_vm2, 1.0, %v902_v5 }
  0x84   :  { %v297_v0 = vadd.f32 %v668_v56, %v666_v57 }
  0x85   :  { %v290_v39 = vpop.permute.xlu1 %289  ;;  %v276_v45 = vpop.permute.xlu0 %275 }
  0x86   :  { %vm292_vm3 = vcmp.eq.s32.totalorder %v290_v39, %v270_v51  ;;  %vm278_vm4 = vcmp.eq.s32.totalorder %v276_v45, %v270_v51 }
  0x87   :  { %v669_v58 = vsel %vm292_vm3, 1.0, %v902_v5  ;;  %v667_v59 = vsel %vm278_vm4, 1.0, %v902_v5 }
  0x88   :  { %v298_v1 = vadd.f32 %v669_v58, %v667_v59 }
  0x8a   :  { %v304_v42 = vpop.permute.xlu1 %303  ;;  %v301_v50 = vpop.permute.xlu0 %300 }
  0x8b   :  { %vm306_vm5 = vcmp.eq.s32.totalorder %v304_v42, %v270_v51  ;;  %vm305_vm6 = vcmp.eq.s32.totalorder %v301_v50, %v270_v51 }
  0x8c   :  { %v671_v61 = vsel %vm306_vm5, 1.0, %v902_v5  ;;  %v670_v62 = vsel %vm305_vm6, 1.0, %v902_v5 }
  0x8d   :  { %v312_v4 = vadd.f32 %v671_v61, %v298_v1  ;;  %v311_v7 = vadd.f32 %v670_v62, %v297_v0 }
  0x8f   :  { %v315_v46 = vpop.permute.xlu1 %314  ;;  %v318_v55 = vpop.permute.xlu0 %317 }
  0x90   :  { %vm319_vm7 = vcmp.eq.s32.totalorder %v315_v46, %v270_v51  ;;  %vm320_vm8 = vcmp.eq.s32.totalorder %v318_v55, %v270_v51 }
  0x91   :  { %v672_v2 = vsel %vm319_vm7, 1.0, %v902_v5  ;;  %v673_v3 = vsel %vm320_vm8, 1.0, %v902_v5 }
  0x92   :  { %v325_v15 = vadd.f32 %v672_v2, %v311_v7  ;;  %v326_v17 = vadd.f32 %v673_v3, %v312_v4 }
  0x94   :  { %v329_v49 = vpop.permute.xlu1 %328  ;;  %v343_v63 = vpop.permute.xlu0 %342 }
  0x95   :  { %vm333_vm9 = vcmp.eq.s32.totalorder %v329_v49, %v270_v51  ;;  %vm347_vm12 = vcmp.eq.s32.totalorder %v343_v63, %v270_v51 }
  0x96   :  { %v674_v11 = vsel %vm333_vm9, 1.0, %v902_v5  ;;  %v676_v22 = vsel %vm347_vm12, 1.0, %v902_v5 }
  0x97   :  { %v339_v19 = vadd.f32 %v674_v11, %v325_v15 }
  0x98   :  { %v332_v53 = vpop.permute.xlu1 %331 }
  0x99   :  { %vm334_vm10 = vcmp.eq.s32.totalorder %v332_v53, %v270_v51  ;;  %v360_v14 = vpop.permute.xlu0 %359  ;;  %v353_v29 = vadd.f32 %v676_v22, %v339_v19 }
  0x9a   :  { %v675_v12 = vsel %vm334_vm10, 1.0, %v902_v5  ;;  %vm362_vm13 = vcmp.eq.s32.totalorder %v360_v14, %v270_v51 }
  0x9b   :  { %v340_v21 = vadd.f32 %v675_v12, %v326_v17  ;;  %v679_v27 = vsel %vm362_vm13, 1.0, %v902_v5 }
  0x9d   :  { %v346_v60 = vpop.permute.xlu1 %345 }
  0x9e   :  { %vm348_vm11 = vcmp.eq.s32.totalorder %v346_v60, %v270_v51 }
  0x9f   :  { %v677_v18 = vsel %vm348_vm11, 1.0, %v902_v5 }
  0xa0   :  { %v354_v26 = vadd.f32 %v677_v18, %v340_v21 }
  0xa2   :  { %v357_v9 = vpop.permute.xlu1 %356  ;;  %v368_v32 = vadd.f32 %v679_v27, %v354_v26 }
  0xa3   :  { %vm361_vm14 = vcmp.eq.s32.totalorder %v357_v9, %v270_v51 }
  0xa4   :  { %v678_v28 = vsel %vm361_vm14, 1.0, %v902_v5 }
  0xa5   :  { %v367_v33 = vadd.f32 %v678_v28, %v353_v29 }
  0xa7   :  { %v371_v24 = vpop.permute.xlu1 %370 }
  0xa8   :  { %vm375_vm15 = vcmp.eq.s32.totalorder %v371_v24, %v270_v51 }
  0xa9   :  { %v680_v30 = vsel %vm375_vm15, 1.0, %v902_v5 }
  0xaa   :  { %v381_v35 = vadd.f32 %v680_v30, %v367_v33 }
  0xab   :  { %v374_v31 = vpop.permute.xlu1 %373 }
  0xac   :  { %vm376_vm1 = vcmp.eq.s32.totalorder %v374_v31, %v270_v51 }
  0xad   :  { %v681_v34 = vsel %vm376_vm1, 1.0, %v902_v5 }
  0xae   :  { %v382_v36 = vadd.f32 %v681_v34, %v368_v32 }
  0xb0   :  { %v383_v37 = vpack.c.bf16 %v382_v36, %v381_v35 }
  0xb2   :  { %800 = vmatmul.mubr.bf16.vlgmr.msra.gmra.mrb[4].mxu0 %v383_v37 }
  0xb3   :  { %824 = vmatpush3.bf16.msra.mxu0 %v975_v6  ;;  %839 = vmatprep.mubr.msk.bf16.mxu0 %vm904_vm0, %v902_v5 }
  0xb4   :  { %825 = vmatprep.subr.bf16.mxu0 %v902_v5 }
  0xb7   :  { %826 = vmatpush3.bf16.msra.mxu0 %v985_v8  ;;  %v665_v8 = vld [vmem:[%s1197_s7] ss:$0 sm:$0xff] }
  0xb8   :  { %827 = vmatprep.subr.bf16.mxu0 %v902_v5 }
  0xbb   :  { %828 = vmatpush3.bf16.msra.mxu0 %v998_v10 }
  0xbc   :  { %829 = vmatprep.subr.bf16.mxu0 %v902_v5 }
  0xbf   :  { %830 = vmatpush3.bf16.msra.mxu0 %v1011_v13 }
  0xc0   :  { %831 = vmatprep.subr.bf16.mxu0 %v902_v5 }
  0xc3   :  { %832 = vmatpush3.bf16.msra.mxu0 %v1027_v16 }
  0xc4   :  { %833 = vmatprep.subr.bf16.mxu0 %v902_v5 }
  0xc7   :  { %834 = vmatpush3.bf16.msra.mxu0 %v1039_v20 }
  0xc8   :  { %835 = vmatprep.subr.bf16.mxu0 %v902_v5 }
  0xcb   :  { %836 = vmatpush3.bf16.msra.mxu0 %v1054_v23 }
  0xcc   :  { %837 = vmatprep.subr.bf16.mxu0 %v902_v5 }
  0xcf   :  { %838 = vmatpush3.bf16.msra.mxu0 %v1066_v25  ;;  %v899_v25 = vld [vmem:[%s1196_s6 + $0x38] sm:$0xff]  }
  0xd0   :  { %818 = vmatpush3.bf16.msra.mxu1 %v899_v25 }
  0xf8   :  { %v155_v6 = vpop.f32.mrb[0].mxu0 }
  0xf9   :  { %v250_v10 = vpop.f32.mrb[0].mxu1  ;;  %v761_v13 = vpop.f32.mrb[1].mxu0 }
  0xfa   :  { %v251_v16 = vadd.f32 %v250_v10, %v155_v6  ;;  %v781_v38 = vpop.f32.mrb[1].mxu1  ;;  %v158_v39 = vpop.f32.mrb[2].mxu0 }
  0xfb   :  { %v253_v40 = vpop.f32.mrb[2].mxu1  ;;  %v762_v20 = vpop.f32.mrb[3].mxu0 }
  0xfc   :  { %v263_v41 = vadd.f32 %v665_v8, %v251_v16  ;;  %v254_v42 = vadd.f32 %v253_v40, %v158_v39  ;;  %v782_v43 = vpop.f32.mrb[3].mxu1 }
  0xfe   :  { %v265_v23 = vmax.f32 %v263_v41, 0.0  ;;  %v264_v44 = vadd.f32 %v665_v8, %v254_v42 }
 0x100   :  { %v266_v5 = vmax.f32 %v264_v44, 0.0 }
 0x102   :  { %v595_v45 = vpack.c.bf16 %v266_v5, %v265_v23 }
 0x104   :  { %840 = vmatmul.mubr.bf16.vlgmr.msra.gmra.mrb[8].mxu0 %v595_v45 }
 0x185   :  { %v482_v46 = vpop.f32.mrb[4].mxu0 }
 0x186   :  { %v801_v47 = vpop.f32.mrb[5].mxu0 }
 0x187   :  { %v485_v48 = vpop.f32.mrb[6].mxu0 }
 0x188   :  { %v489_v49 = vpack.c.bf16 %v485_v48, %v482_v46  ;;  %v802_v50 = vpop.f32.mrb[7].mxu0 }
 0x18a   :  { %820 = vmatmul.mubr.bf16.vlgmr.msra.gmra.mrb[4].mxu1 %v489_v49 }
 0x1d7   :  { %v630_v51 = vpop.f32.mrb[8].mxu0 }
 0x1d8   :  { %v841_v52 = vpop.f32.mrb[9].mxu0 }
 0x1d9   :  { %v633_v53 = vpop.f32.mrb[10].mxu0 }
 0x1da   :  { %v842_v54 = vpop.f32.mrb[11].mxu0 }
 0x25d   :  { %v588_v55 = vpop.f32.mrb[4].mxu1 }
 0x25e   :  { %v631_v56 = vadd.f32 %v630_v51, %v588_v55  ;;  %v821_v57 = vpop.f32.mrb[5].mxu1 }
 0x25f   :  { %v591_v58 = vpop.f32.mrb[6].mxu1 }
 0x260   :  { %v637_v59 = vadd.f32 %v665_v8, %v631_v56  ;;  %v634_v60 = vadd.f32 %v633_v53, %v591_v58  ;;  %v822_v61 = vpop.f32.mrb[7].mxu1 }
 0x262   :  { %v639_v62 = vmax.f32 %v637_v59, 0.0  ;;  %v638_v63 = vadd.f32 %v665_v8, %v634_v60 }
 0x264   :  { %641 = vst [vmem:[%s1198_s8] sm:$0xff] %v639_v62  ;;  %v640_v0 = vmax.f32 %v638_v63, 0.0 }
 0x266   :  { %642 = vst [vmem:[%s1198_s8 + $0x8] sm:$0xff] %v640_v0 }

</bundles_post_ra>
